<compile_context>
chip_gen: v6e
topology: v6e:2x2x1
jax: 0.10.0
libtpu: 0.0.40
codegen_flags: <defaults>
</compile_context>

<pallas_src>
import math
from functools import partial

import jax
import jax.numpy as jnp
from jax import lax
from jax.experimental import pallas as pl
from jax.experimental.pallas import tpu as pltpu


def _round_up(x: int, m: int) -> int:
    return ((x + m - 1) // m) * m


def _linear_kernel(x_ref, w_ref, b_ref, o_ref):
    # x_ref: (TB, D)       VMEM  (streamed per grid step)
    # w_ref: (C_pad, D)    VMEM  (resident; nn.Linear layout, NOT transposed)
    # b_ref: (1, C_pad)    VMEM  (resident; f32)
    # o_ref: (TB, C_pad)   VMEM  (lane-dense: C_pad % 128 == 0)
    acc = lax.dot_general(
        x_ref[...],
        w_ref[...],
        dimension_numbers=(((1,), (1,)), ((), ())),  # contract D with D
        preferred_element_type=jnp.float32,          # f32 MXU accumulation
    )
    o_ref[...] = (acc + b_ref[...]).astype(o_ref.dtype)


def prepare_linear_params(weight, bias, *, compute_dtype=None):
    """One-time parameter prep (do at init, not per forward call).

    weight: (C, D) float32, nn.Linear convention.
    bias:   (C,)   float32.
    Returns (w_pad, b_pad) with the class dim padded to a multiple of 128.
    """
    C, D = weight.shape
    C_pad = _round_up(max(C, 128), 128)
    w = weight if compute_dtype is None else weight.astype(compute_dtype)
    w_pad = jnp.zeros((C_pad, D), w.dtype).at[:C, :].set(w)
    # Bias / epilogue stays f32 (v5e VPU has no fast bf16 elementwise).
    b_pad = jnp.zeros((1, C_pad), jnp.float32).at[0, :C].set(
        bias.astype(jnp.float32))
    return w_pad, b_pad


@partial(jax.jit, static_argnames=("num_classes", "block_b", "compute_dtype"))
def linear_classifier_forward_prepared(features, w_pad, b_pad, num_classes,
                                       *, block_b=256, compute_dtype=None):
    """logits = features @ W^T + b using pre-padded params."""
    B, D = features.shape
    C_pad = w_pad.shape[0]
    assert w_pad.shape[1] == D and b_pad.shape == (1, C_pad)

    x = features if compute_dtype is None else features.astype(compute_dtype)

    # Batch tiling: TB is a multiple of 8 (sublane), capped at block_b.
    TB = min(_round_up(B, 8), block_b)
    B_pad = _round_up(B, TB)
    if B_pad != B:
        x = jnp.pad(x, ((0, B_pad - B), (0, 0)))
    grid = (B_pad // TB,)

    bytes_per_el = jnp.dtype(x.dtype).itemsize
    cost = pl.CostEstimate(
        flops=2 * B_pad * D * C_pad,
        transcendentals=0,
        bytes_accessed=(bytes_per_el * (B_pad * D + C_pad * D)
                        + 4 * (B_pad * C_pad + C_pad)),
    )

    out = pl.pallas_call(
        _linear_kernel,
        out_shape=jax.ShapeDtypeStruct((B_pad, C_pad), jnp.float32),
        grid=grid,
        in_specs=[
            pl.BlockSpec((TB, D), lambda i: (i, 0)),        # streamed x tiles
            pl.BlockSpec((C_pad, D), lambda i: (0, 0)),     # resident weight
            pl.BlockSpec((1, C_pad), lambda i: (0, 0)),     # resident bias
        ],
        out_specs=pl.BlockSpec((TB, C_pad), lambda i: (i, 0)),
        compiler_params=pltpu.CompilerParams(
            dimension_semantics=("parallel",),  # megacore on v7x
        ),
        cost_estimate=cost,
    )(x, w_pad, b_pad)

    # Slice away batch + class padding (cheap view-level ops in XLA).
    return out[:B, :num_classes]


def linear_classifier_forward(features, weight, bias, *, block_b=256,
                              compute_dtype=None):
    """Pallas equivalent of LinearClassifier.forward.

    features: [B, D] float32
    weight:   [C, D] float32 (PyTorch nn.Linear convention)
    bias:     [C]    float32
    returns logits: [B, C] float32
    """
    w_pad, b_pad = prepare_linear_params(weight, bias,
                                         compute_dtype=compute_dtype)
    return linear_classifier_forward_prepared(
        features, w_pad, b_pad, int(weight.shape[0]),
        block_b=block_b, compute_dtype=compute_dtype)


if __name__ == "__main__":
    # Module config: feature_dim=128, classid_list of 10 classes.
    classid_list = list(range(10))
    feature_dim = 128
    num_classes = len(classid_list)
    batch = 8

    key = jax.random.PRNGKey(0)
    k_x, k_w, k_b = jax.random.split(key, 3)

    # Deterministic nn.Linear-style init: U(-1/sqrt(D), 1/sqrt(D))
    bound = 1.0 / math.sqrt(feature_dim)
    weight = jax.random.uniform(k_w, (num_classes, feature_dim),
                                jnp.float32, -bound, bound)
    bias = jax.random.uniform(k_b, (num_classes,), jnp.float32, -bound, bound)

    features = jax.random.normal(k_x, (batch, feature_dim), jnp.float32)

    logits = linear_classifier_forward(features, weight, bias)
    logits = jax.block_until_ready(logits)

    # Reference check (plain JAX).
    ref = features @ weight.T + bias
    assert logits.shape == (batch, num_classes)
    assert jnp.allclose(logits, ref, atol=1e-5, rtol=1e-5)

    # Also exercise a batch that needs a real grid + batch padding.
    big_batch = 600
    big_features = jax.random.normal(jax.random.PRNGKey(1),
                                     (big_batch, feature_dim), jnp.float32)
    big_logits = jax.block_until_ready(
        linear_classifier_forward(big_features, weight, bias))
    big_ref = big_features @ weight.T + bias
    assert big_logits.shape == (big_batch, num_classes)
    assert jnp.allclose(big_logits, big_ref, atol=1e-4, rtol=1e-4)

    print("KERNEL_OK")
</pallas_src>

<mosaic_0001>
module attributes {stable_mosaic.version = 11 : i64} {
  func.func @_linear_kernel(%arg0: i32, %arg1: memref<8x128xf32, #tpu.memory_space<vmem>>, %arg2: memref<128x128xf32, #tpu.memory_space<vmem>>, %arg3: memref<1x128xf32, #tpu.memory_space<vmem>>, %arg4: memref<8x128xf32, #tpu.memory_space<vmem>>) attributes {dimension_semantics = [#tpu.dimension_semantics<parallel>], iteration_bounds = array<i64: 1>, scalar_prefetch = 0 : i64, scratch_operands = 0 : i64, tpu.core_type = #tpu.core_type<tc>, window_params = [{transform_indices = @transform_0, window_bounds = array<i64: 8, 128>}, {pipeline_mode = #tpu.pipeline_mode<synchronous>, transform_indices = @transform_1, window_bounds = array<i64: 128, 128>}, {pipeline_mode = #tpu.pipeline_mode<synchronous>, transform_indices = @transform_2, window_bounds = array<i64: 1, 128>}, {transform_indices = @transform_3, window_bounds = array<i64: 8, 128>}]} {
    %c0 = arith.constant 0 : index
    %c0_0 = arith.constant 0 : index
    %0 = vector.load %arg1[%c0, %c0_0] : memref<8x128xf32, #tpu.memory_space<vmem>>, vector<8x128xf32>
    %c0_1 = arith.constant 0 : index
    %c0_2 = arith.constant 0 : index
    %1 = vector.load %arg2[%c0_1, %c0_2] : memref<128x128xf32, #tpu.memory_space<vmem>>, vector<128x128xf32>
    %cst = arith.constant dense<0.000000e+00> : vector<8x128xf32>
    %2 = tpu.matmul %0, %1, %cst {dimension_numbers = #tpu.dot_dimension_numbers<[1], [1], [0], [0], [0, 0, 1, 0], [], []>} : vector<8x128xf32>, vector<128x128xf32>, vector<8x128xf32> -> vector<8x128xf32>
    %c0_3 = arith.constant 0 : index
    %c0_4 = arith.constant 0 : index
    %3 = vector.load %arg3[%c0_3, %c0_4] : memref<1x128xf32, #tpu.memory_space<vmem>>, vector<1x128xf32>
    %4 = vector.broadcast %3 : vector<1x128xf32> to vector<8x128xf32>
    %5 = arith.addf %2, %4 : vector<8x128xf32>
    %c0_5 = arith.constant 0 : index
    %c0_6 = arith.constant 0 : index
    %6 = vector.load %arg4[%c0_5, %c0_6] : memref<8x128xf32, #tpu.memory_space<vmem>>, vector<8x128xf32>
    tpu.vector_store %arg4[%c0_5, %c0_6], %5 {strides = array<i32>} : memref<8x128xf32, #tpu.memory_space<vmem>>, vector<8x128xf32>,
    return
  }
  func.func @transform_0(%arg0: i32) -> (i32, i32) {
    %c0_i32 = arith.constant 0 : i32
    %c0_i32_0 = arith.constant 0 : i32
    return %arg0, %c0_i32 : i32, i32
  }
  func.func @transform_1(%arg0: i32) -> (i32, i32) {
    %c0_i32 = arith.constant 0 : i32
    %c0_i32_0 = arith.constant 0 : i32
    %c0_i32_1 = arith.constant 0 : i32
    return %c0_i32, %c0_i32_0 : i32, i32
  }
  func.func @transform_2(%arg0: i32) -> (i32, i32) {
    %c0_i32 = arith.constant 0 : i32
    %c0_i32_0 = arith.constant 0 : i32
    %c0_i32_1 = arith.constant 0 : i32
    return %c0_i32, %c0_i32_0 : i32, i32
  }
  func.func @transform_3(%arg0: i32) -> (i32, i32) {
    %c0_i32 = arith.constant 0 : i32
    %c0_i32_0 = arith.constant 0 : i32
    return %arg0, %c0_i32 : i32, i32
  }
}

</mosaic_0001>

<bundles_post_ra>
// kernel: linear_classifier_forward_prepared.1
= control target key start
LH: loop header
LB: loop body
LE: loop exit
PB: predicated region body
PF: predicated region fallthrough
CT: control target
= control target key end

     0   :  { %8 = vsyncpa [#allocation3], 0  ;;  %s317_s0 = inlined_call_operand.hbm [shape: f32[8,128], index: 0, kind: input, shape index: {}]   ;;  %s318_s1 = inlined_call_operand.hbm [shape: f32[128,128], index: 1, kind: input, shape index: {}]   ;;  %s319_s2 = inlined_call_operand.vmem [shape: f32[1,128], index: 2, kind: input, shape index: {}]   ;;  %s320_s3 = inlined_call_operand.hbm [shape: f32[8,128], index: 3, kind: output, shape index: {}]  }
   0x1   :  { %9 = vsyncpa [#allocation6], 0 }
   0x2   :  { %10 = vsyncpa [#allocation4], 0  ;;  %s278_s12 = smov [#allocation2]   ;;  %s279_s14 = smov [#allocation5]  }
   0x3   :  { %s17_s13 = sshll.u32 %s278_s12, 4  ;;  %s26_s15 = sshll.u32 %s279_s14, 4  ;;  %s18_s13 = int_to_ptr.vmem [resolvable:$true] %s17_s13  ;;  %s27_s15 = int_to_ptr.vmem [resolvable:$true] %s26_s15 }
   0x4   :  { %s220_s16 = scalar_lea.vmem %s18_s13, 128  ;;  %p225_p1 = scmp.lt.s32.totalorder %s18_s13, %s18_s13 }
   0x5   :  { %p221_p0 = scmp.ne.s32.totalorder %s18_s13, %s220_s16  ;;  %p226_p2 = scmp.lt.s32.totalorder %s220_s16, %s220_s16 }
   0x7   :  { %p227_p3 = por %p226_p2, %p225_p1 }
   0x9   :  { %p228_p4 = pnand %p227_p3, %p221_p0 }
   0xb   :  { %231 = shalt.err (!%p228_p4)
}
   0xc   :  { %20 = dma.hbm_to_vmem [thread:$0]  %s317_s0, 128, %s18_s13, [#allocation3]  }
   0xd   :  { %s240_s19 = scalar_lea.vmem %s27_s15, 2048  ;;  %p245_p6 = scmp.lt.s32.totalorder %s27_s15, %s27_s15 }
   0xe   :  { %p241_p5 = scmp.ne.s32.totalorder %s27_s15, %s240_s19  ;;  %p246_p7 = scmp.lt.s32.totalorder %s240_s19, %s240_s19 }
  0x10   :  { %p247_p8 = por %p246_p7, %p245_p6 }
  0x12   :  { %p248_p9 = pnand %p247_p8, %p241_p5 }
  0x14   :  { %251 = shalt.err (!%p248_p9)
}
  0x15   :  { %s280_s20 = smov 128   ;;  %s281_s21 = smov 8  }
  0x16   :  { %32 = dma.hbm_to_vmem [thread:$0]  %s318_s1, 2048, %s27_s15, [#allocation6], %s280_s20, %s280_s20, %s281_s21  }
  0x17   :  { %272 = dma.done.wait [#allocation3], 128  }
  0x18   :  { %273 = vsyncadd [#allocation3], 4294967168 }
  0x19   :  { %274 = dma.done.wait [#allocation6], 2048  }
  0x1a   :  { %275 = vsyncadd [#allocation6], 4294965248  ;;  %v282_v0 = vmov 0.0   ;;  %vm283_vm0 = vmmov 0   ;;  %v57_v1 = vld [vmem:[#allocation5 + $0x78] sm:$0xff]  ;;  %v56_v2 = vld [vmem:[#allocation5 + $0x70] sm:$0xff] }
  0x1b   :  { %170 = vmatprep.subr.mxu0 %v282_v0  ;;  %202 = vmatprep.mubr.msk.f32.mxu0 %vm283_vm0, %v282_v0  ;;  %v55_v3 = vld [vmem:[#allocation5 + $0x68] sm:$0xff]  ;;  %v54_v4 = vld [vmem:[#allocation5 + $0x60] sm:$0xff]  ;;  %v53_v5 = vld [vmem:[#allocation5 + $0x58] sm:$0xff]  ;;  %s284_s24 = smov [#allocation7]  }
  0x1c   :  { %171 = vmatpush3.xpose.msra.mxu0 %v57_v1  ;;  %v52_v6 = vld [vmem:[#allocation5 + $0x50] sm:$0xff]  ;;  %v51_v7 = vld [vmem:[#allocation5 + $0x48] sm:$0xff]  ;;  %v50_v8 = vld [vmem:[#allocation5 + $0x40] sm:$0xff]  ;;  %s142_s25 = sshll.u32 %s284_s24, 4  ;;  %s143_s25 = int_to_ptr.vmem [resolvable:$true] %s142_s25 }
  0x1d   :  { %172 = vmatprep.subr.mxu0 %v282_v0  ;;  %v49_v9 = vld [vmem:[#allocation5 + $0x38] sm:$0xff]  ;;  %v48_v10 = vld [vmem:[#allocation5 + $0x30] sm:$0xff]  ;;  %v47_v11 = vld [vmem:[#allocation5 + $0x28] sm:$0xff]  ;;  %s252_s26 = scalar_lea.vmem %s143_s25, 128  ;;  %p257_p11 = scmp.lt.s32.totalorder %s143_s25, %s143_s25 }
  0x1e   :  { %v46_v12 = vld [vmem:[#allocation5 + $0x20] sm:$0xff]  ;;  %v45_v13 = vld [vmem:[#allocation5 + $0x18] sm:$0xff]  ;;  %v44_v14 = vld [vmem:[#allocation5 + $0x10] sm:$0xff]  ;;  %p253_p10 = scmp.ne.s32.totalorder %s143_s25, %s252_s26  ;;  %p258_p12 = scmp.lt.s32.totalorder %s252_s26, %s252_s26 }
  0x1f   :  { %v43_v15 = vld [vmem:[#allocation5 + $0x8] sm:$0xff]  ;;  %v42_v16 = vld [vmem:[#allocation5] sm:$0xff]  ;;  %v41_v17 = vld [vmem:[#allocation2] sm:$0xff] }
  0x20   :  { %173 = vmatpush3.xpose.msra.mxu0 %v56_v2  ;;  %v152_v18 = vld [vmem:[%s319_s2] ss:$0 sm:$0xff]  ;;  %p259_p13 = por %p258_p12, %p257_p11 }
  0x21   :  { %174 = vmatprep.subr.mxu0 %v282_v0 }
  0x22   :  { %p260_p0 = pnand %p259_p13, %p253_p10 }
  0x24   :  { %175 = vmatpush3.xpose.msra.mxu0 %v55_v3 }
  0x25   :  { %176 = vmatprep.subr.mxu0 %v282_v0 }
  0x28   :  { %177 = vmatpush3.xpose.msra.mxu0 %v54_v4 }
  0x29   :  { %178 = vmatprep.subr.mxu0 %v282_v0 }
  0x2c   :  { %179 = vmatpush3.xpose.msra.mxu0 %v53_v5 }
  0x2d   :  { %180 = vmatprep.subr.mxu0 %v282_v0 }
  0x30   :  { %181 = vmatpush3.xpose.msra.mxu0 %v52_v6 }
  0x31   :  { %182 = vmatprep.subr.mxu0 %v282_v0 }
  0x34   :  { %183 = vmatpush3.xpose.msra.mxu0 %v51_v7 }
  0x35   :  { %184 = vmatprep.subr.mxu0 %v282_v0 }
  0x38   :  { %185 = vmatpush3.xpose.msra.mxu0 %v50_v8 }
  0x39   :  { %186 = vmatprep.subr.mxu0 %v282_v0 }
  0x3c   :  { %187 = vmatpush3.xpose.msra.mxu0 %v49_v9 }
  0x3d   :  { %188 = vmatprep.subr.mxu0 %v282_v0 }
  0x40   :  { %189 = vmatpush3.xpose.msra.mxu0 %v48_v10 }
  0x41   :  { %190 = vmatprep.subr.mxu0 %v282_v0 }
  0x44   :  { %191 = vmatpush3.xpose.msra.mxu0 %v47_v11 }
  0x45   :  { %192 = vmatprep.subr.mxu0 %v282_v0 }
  0x48   :  { %193 = vmatpush3.xpose.msra.mxu0 %v46_v12 }
  0x49   :  { %194 = vmatprep.subr.mxu0 %v282_v0 }
  0x4c   :  { %195 = vmatpush3.xpose.msra.mxu0 %v45_v13 }
  0x4d   :  { %196 = vmatprep.subr.mxu0 %v282_v0 }
  0x50   :  { %197 = vmatpush3.xpose.msra.mxu0 %v44_v14 }
  0x51   :  { %198 = vmatprep.subr.mxu0 %v282_v0 }
  0x54   :  { %199 = vmatpush3.xpose.msra.mxu0 %v43_v15 }
  0x55   :  { %200 = vmatprep.subr.mxu0 %v282_v0 }
  0x58   :  { %201 = vmatpush3.xpose.msra.mxu0 %v42_v16 }
  0x5b   :  { %203 = vmatmul.mubr.f32.vlgmr.msra.gmra.mxu0 %v41_v17 }
 0x11b   :  { %v131_v19 = vpop.f32.mrf.mxu0 }
 0x11c   :  { %v132_v20 = vadd.f32 %v152_v18, %v131_v19 }
 0x11d   :  { %v204_v21 = vpop.f32.mrf.mxu0 }
 0x11e   :  { %135 = vst [vmem:[#allocation7] sm:$0xff] %v132_v20 }
 0x11f   :  { %263 = shalt.err (!%p260_p0)
}
 0x120   :  { %145 = dma.vmem_to_hbm [thread:$0]  %s143_s25, 128, %s320_s3, [#allocation4]  }
 0x121   :  { %276 = dma.done.wait [#allocation4], 128  }
 0x122   :  { %277 = vsyncadd [#allocation4], 4294967168 }
 0x123   :  { %149 = vsyncpa [#allocation3], 1 }
 0x124   :  { %150 = vsyncpa [#allocation6], 1 }
 0x125   :  { %151 = vsyncpa [#allocation4], 1 }

</bundles_post_ra>
